<compile_context>
chip_gen: v7x
topology: tpu7x:2x2x1
jax: 0.10.0
libtpu: 0.0.40
codegen_flags: <defaults>
</compile_context>

<pallas_src>
import jax
import jax.numpy as jnp
from jax.experimental import pallas as pl
from jax.experimental.pallas import tpu as pltpu

_MIB = 1024 * 1024


def _round_up(x, m):
    return ((x + m - 1) // m) * m


# ---------------------------------------------------------------------------
# Hardware VMEM budget (generation aware, conservative fallback = v7x-class)
# ---------------------------------------------------------------------------
def _vmem_physical_bytes():
    try:
        info = pltpu.get_tpu_info()
        for attr in ("vmem_capacity_bytes", "vmem_bytes", "vmem_size_bytes"):
            v = getattr(info, attr, None)
            if v:
                return int(v)
    except Exception:
        pass
    try:
        kind = jax.devices()[0].device_kind.lower()
        if "v7" in kind:
            return 64 * _MIB
        if "v5" in kind or "v6" in kind:
            return 128 * _MIB
    except Exception:
        pass
    return 64 * _MIB


def _vmem_budget_bytes():
    phys = _vmem_physical_bytes()
    if phys <= 64 * _MIB:                  # v7x-class: leave compiler headroom
        return 52 * _MIB
    return min(100 * _MIB, phys - 28 * _MIB)   # v5e / v6e: ~100 MiB


# ---------------------------------------------------------------------------
# Kernels
# ---------------------------------------------------------------------------
def _ffn_fused_kernel(x_ref, w1_ref, b1_ref, w2_ref, b2_ref, o_ref):
    # Whole d_ff resident in VMEM: weights are DMA'd once for the entire call.
    h = jnp.dot(x_ref[...].astype(w1_ref.dtype), w1_ref[...],
                preferred_element_type=jnp.float32)
    h = jnp.maximum(h + b1_ref[...], 0.0)
    # Dropout (eval / inference mode) == identity.
    y = jnp.dot(h.astype(w2_ref.dtype), w2_ref[...],
                preferred_element_type=jnp.float32)
    o_ref[...] = (y + b2_ref[...]).astype(o_ref.dtype)


def _ffn_stream_accout_kernel(x_ref, w1_ref, b1_ref, w2_ref, b2_ref, o_ref):
    # d_ff streamed in tf chunks; f32 output doubles as the accumulator.
    f = pl.program_id(1)

    @pl.when(f == 0)
    def _init():
        o_ref[...] = jnp.zeros_like(o_ref)

    h = jnp.dot(x_ref[...].astype(w1_ref.dtype), w1_ref[...],
                preferred_element_type=jnp.float32)
    h = jnp.maximum(h + b1_ref[...], 0.0)
    # Dropout (eval / inference mode) == identity.
    o_ref[...] += jnp.dot(h.astype(w2_ref.dtype), w2_ref[...],
                          preferred_element_type=jnp.float32)

    @pl.when(f == pl.num_programs(1) - 1)
    def _finalize():
        o_ref[...] += b2_ref[...]


def _ffn_stream_scratch_kernel(x_ref, w1_ref, b1_ref, w2_ref, b2_ref, o_ref,
                               acc_ref):
    # d_ff streamed; non-f32 output -> f32 VMEM scratch accumulator.
    f = pl.program_id(1)

    @pl.when(f == 0)
    def _init():
        acc_ref[...] = jnp.zeros_like(acc_ref)

    h = jnp.dot(x_ref[...].astype(w1_ref.dtype), w1_ref[...],
                preferred_element_type=jnp.float32)
    h = jnp.maximum(h + b1_ref[...], 0.0)
    # Dropout (eval / inference mode) == identity.
    acc_ref[...] += jnp.dot(h.astype(w2_ref.dtype), w2_ref[...],
                            preferred_element_type=jnp.float32)

    @pl.when(f == pl.num_programs(1) - 1)
    def _finalize():
        o_ref[...] = (acc_ref[...] + b2_ref[...]).astype(o_ref.dtype)


# ---------------------------------------------------------------------------
# VMEM footprint models (double-buffered tiles + h intermediate + cast copy)
# ---------------------------------------------------------------------------
def _fused_footprint(tm, d_model, d_ff, x_isz, w_isz, o_isz):
    return (2 * tm * d_model * x_isz            # x tile
            + 2 * d_model * d_ff * w_isz        # W1
            + 2 * d_ff * 4                      # b1
            + 2 * d_ff * d_model * w_isz        # W2
            + 2 * d_model * 4                   # b2
            + 2 * tm * d_model * o_isz          # out tile
            + tm * d_ff * (4 + w_isz))          # h (f32) + its cast copy


def _stream_footprint(tm, tf, d_model, x_isz, w_isz, o_isz, use_scratch):
    fp = (2 * tm * d_model * x_isz
          + 2 * d_model * tf * w_isz
          + 2 * tf * 4
          + 2 * tf * d_model * w_isz
          + 2 * d_model * 4
          + 2 * tm * d_model * o_isz
          + tm * tf * (4 + w_isz))              # h (f32) + its cast copy
    if use_scratch:
        fp += tm * d_model * 4                  # f32 accumulator
    return fp


def _choose_tm(M, requested, footprint_fn, budget):
    if requested is not None:
        return max(8, _round_up(requested, 8))
    M16 = _round_up(M, 16)
    if M16 <= 1024:
        tm = M16
    else:
        tm = 128
        for t in (1024, 768, 512, 384, 256, 128):   # prefer MXU-aligned tiles
            if footprint_fn(t) <= budget:
                tm = t
                break
    while tm > 16 and footprint_fn(tm) > budget:
        tm = max(16, _round_up(tm // 2, 16))
    # Keep >= 2 token tiles so the "parallel" axis can shard across both
    # TensorCores on v7x-class chips.
    if _round_up(M, tm) // tm < 2 and M16 >= 512:
        half = _round_up((M16 + 1) // 2, 128)
        if footprint_fn(half) <= budget:
            tm = half
    return tm


# ---------------------------------------------------------------------------
# Public API
# ---------------------------------------------------------------------------
def make_feed_forward(w1, b1, w2, b2, *, compute_dtype=jnp.bfloat16,
                      out_dtype=None, tm=None, tf=None, interpret=False):
    """Prepare the FFN once (cast/pad weights) and return apply(x).

    w1: (d_model, d_ff), w2: (d_ff, d_model) — (in, out) layout.
    compute_dtype: dtype of the MXU operands (default bf16; accumulation and
                   biases stay f32).  Pass jnp.float32 for exact parity.
    """
    d_model, d_ff = w1.shape
    assert w2.shape == (d_ff, d_model)
    w_dtype = (jnp.dtype(compute_dtype) if compute_dtype is not None
               else jnp.dtype(w1.dtype))
    w_isz = w_dtype.itemsize
    budget = _vmem_budget_bytes()

    # ---- d_ff tiling decision (once) -------------------------------------
    force_stream = (tf is not None) and (tf < d_ff)
    fused = (not force_stream and
             _fused_footprint(256, d_model, d_ff, 4, w_isz, 4) <= budget)
    if fused:
        tf_eff, d_ff_pad = d_ff, d_ff
    else:
        if tf is None or tf >= d_ff:
            tf_eff = max(512, _round_up(max(128, d_model // 2), 128))
        else:
            tf_eff = max(128, (tf // 128) * 128)
        tf_eff = min(tf_eff, _round_up(d_ff, 128))
        while (tf_eff > 128 and
               _stream_footprint(256, tf_eff, d_model, 4, w_isz, 4, True)
               > budget):
            tf_eff = max(128, _round_up(tf_eff // 2, 128))
        d_ff_pad = _round_up(d_ff, tf_eff)

    # ---- one-time weight cast + pad (hoisted out of the per-call path) ----
    w1p = jnp.asarray(w1, w_dtype)
    w2p = jnp.asarray(w2, w_dtype)
    b1p = jnp.asarray(b1, jnp.float32).reshape(1, d_ff)
    b2p = jnp.asarray(b2, jnp.float32).reshape(1, d_model)
    if d_ff_pad != d_ff:
        pad = d_ff_pad - d_ff
        w1p = jnp.pad(w1p, ((0, 0), (0, pad)))   # relu(0 + 0) = 0 -> exact
        b1p = jnp.pad(b1p, ((0, 0), (0, pad)))
        w2p = jnp.pad(w2p, ((0, pad), (0, 0)))

    def apply(x):
        batch, seq, dm = x.shape
        if dm != d_model:
            raise ValueError(f"expected d_model={d_model}, got {dm}")
        odt = (jnp.dtype(out_dtype) if out_dtype is not None
               else jnp.dtype(x.dtype))
        M = batch * seq
        x2 = x.reshape(M, d_model)
        x_isz = jnp.dtype(x2.dtype).itemsize
        o_isz = odt.itemsize
        use_scratch = (not fused) and odt != jnp.dtype(jnp.float32)

        if fused:
            fp_fn = lambda t: _fused_footprint(t, d_model, d_ff_pad,
                                               x_isz, w_isz, o_isz)
        else:
            fp_fn = lambda t: _stream_footprint(t, tf_eff, d_model,
                                                x_isz, w_isz, o_isz,
                                                use_scratch)
        tm_eff = _choose_tm(M, tm, fp_fn, budget)
        M_pad = _round_up(M, tm_eff)
        x2p = jnp.pad(x2, ((0, M_pad - M), (0, 0))) if M_pad != M else x2

        n_m = M_pad // tm_eff
        vmem_limit = int(min(budget, max(fp_fn(tm_eff) * 5 // 4, 16 * _MIB)))
        weight_bytes = ((w1p.size + w2p.size) * w_isz
                        + (b1p.size + b2p.size) * 4)

        if fused:
            grid = (n_m,)
            in_specs = [
                pl.BlockSpec((tm_eff, d_model), lambda i: (i, 0)),
                pl.BlockSpec((d_model, d_ff_pad), lambda i: (0, 0)),
                pl.BlockSpec((1, d_ff_pad), lambda i: (0, 0)),
                pl.BlockSpec((d_ff_pad, d_model), lambda i: (0, 0)),
                pl.BlockSpec((1, d_model), lambda i: (0, 0)),
            ]
            out_specs = pl.BlockSpec((tm_eff, d_model), lambda i: (i, 0))
            scratch_shapes = []
            kernel = _ffn_fused_kernel
            dims = ("parallel",)
            weight_passes = 1
        else:
            n_f = d_ff_pad // tf_eff
            grid = (n_m, n_f)
            in_specs = [
                pl.BlockSpec((tm_eff, d_model), lambda i, f: (i, 0)),
                pl.BlockSpec((d_model, tf_eff), lambda i, f: (0, f)),
                pl.BlockSpec((1, tf_eff), lambda i, f: (0, f)),
                pl.BlockSpec((tf_eff, d_model), lambda i, f: (f, 0)),
                pl.BlockSpec((1, d_model), lambda i, f: (0, 0)),
            ]
            out_specs = pl.BlockSpec((tm_eff, d_model), lambda i, f: (i, 0))
            if use_scratch:
                scratch_shapes = [pltpu.VMEM((tm_eff, d_model), jnp.float32)]
                kernel = _ffn_stream_scratch_kernel
            else:
                scratch_shapes = []
                kernel = _ffn_stream_accout_kernel
            dims = ("parallel", "arbitrary")
            weight_passes = n_m

        cost = pl.CostEstimate(
            flops=4 * M_pad * d_model * d_ff_pad,
            transcendentals=0,
            bytes_accessed=int(M_pad * d_model * (x_isz + o_isz)
                               + weight_passes * weight_bytes),
        )

        out2 = pl.pallas_call(
            kernel,
            out_shape=jax.ShapeDtypeStruct((M_pad, d_model), odt),
            grid_spec=pltpu.PrefetchScalarGridSpec(
                num_scalar_prefetch=0,
                grid=grid,
                in_specs=in_specs,
                out_specs=out_specs,
                scratch_shapes=scratch_shapes,
            ),
            compiler_params=pltpu.CompilerParams(
                dimension_semantics=dims,
                vmem_limit_bytes=vmem_limit,
            ),
            cost_estimate=cost,
            interpret=interpret,
        )(x2p, w1p, b1p, w2p, b2p)

        if M_pad != M:
            out2 = out2[:M]
        return out2.reshape(batch, seq, d_model)

    return apply


def feed_forward(x, w1, b1, w2, b2, **kwargs):
    """One-shot convenience wrapper (prefer make_feed_forward to hoist the
    per-call weight cast / pad)."""
    return make_feed_forward(w1, b1, w2, b2, **kwargs)(x)


def feed_forward_ref(x, w1, b1, w2, b2):
    h = jnp.maximum(jnp.dot(x, w1) + b1.reshape(-1), 0.0)
    return jnp.dot(h, w2) + b2.reshape(-1)


if __name__ == "__main__":
    key = jax.random.PRNGKey(0)
    kx, k1, kb1, k2, kb2, kx2 = jax.random.split(key, 6)

    batch, seq, d_model, d_ff = 2, 8, 32, 64
    lim1 = 1.0 / d_model ** 0.5
    lim2 = 1.0 / d_ff ** 0.5
    x = jax.random.normal(kx, (batch, seq, d_model), jnp.float32)
    w1 = jax.random.uniform(k1, (d_model, d_ff), jnp.float32, -lim1, lim1)
    b1 = jax.random.uniform(kb1, (1, d_ff), jnp.float32, -lim1, lim1)
    w2 = jax.random.uniform(k2, (d_ff, d_model), jnp.float32, -lim2, lim2)
    b2 = jax.random.uniform(kb2, (1, d_model), jnp.float32, -lim2, lim2)

    # --- Test 1: fused path, exact f32 compute -----------------------------
    ffn_f32 = make_feed_forward(w1, b1, w2, b2, compute_dtype=jnp.float32)
    out = jax.block_until_ready(ffn_f32(x))
    ref = feed_forward_ref(x, w1, b1, w2, b2)
    assert out.shape == (batch, seq, d_model)
    assert jnp.allclose(out, ref, atol=1e-4, rtol=1e-4), "test 1 mismatch"

    # --- Test 2: ragged M + forced d_ff streaming, f32 accumulate-in-output
    batch2, seq2, d_ff2 = 2, 20, 160
    lim2b = 1.0 / d_ff2 ** 0.5
    x2 = jax.random.normal(kx2, (batch2, seq2, d_model), jnp.float32)
    w1b = jax.random.uniform(k1, (d_model, d_ff2), jnp.float32, -lim1, lim1)
    b1b = jax.random.uniform(kb1, (1, d_ff2), jnp.float32, -lim1, lim1)
    w2b = jax.random.uniform(k2, (d_ff2, d_model), jnp.float32, -lim2b, lim2b)
    b2b = jax.random.uniform(kb2, (1, d_model), jnp.float32, -lim2b, lim2b)

    ffn_stream = make_feed_forward(w1b, b1b, w2b, b2b,
                                   compute_dtype=jnp.float32, tf=128)
    out2 = jax.block_until_ready(ffn_stream(x2))
    ref2 = feed_forward_ref(x2, w1b, b1b, w2b, b2b)
    assert out2.shape == (batch2, seq2, d_model)
    assert jnp.allclose(out2, ref2, atol=1e-4, rtol=1e-4), "test 2 mismatch"

    # --- Test 3: default bf16 compute (f32 in/out), fused ------------------
    ffn_bf16 = make_feed_forward(w1, b1, w2, b2)   # compute_dtype=bf16 default
    out3 = jax.block_until_ready(ffn_bf16(x))
    ref3 = feed_forward_ref(x.astype(jnp.bfloat16).astype(jnp.float32),
                            w1.astype(jnp.bfloat16).astype(jnp.float32), b1,
                            w2.astype(jnp.bfloat16).astype(jnp.float32), b2)
    assert jnp.allclose(out3, ref3, atol=2e-2, rtol=2e-2), "test 3 mismatch"

    # --- Test 4: bf16 activations + streaming -> scratch-accumulator path --
    x2b = x2.astype(jnp.bfloat16)
    ffn_bf16_stream = make_feed_forward(w1b, b1b, w2b, b2b, tf=128)
    out4 = jax.block_until_ready(ffn_bf16_stream(x2b))
    ref4 = feed_forward_ref(x2b.astype(jnp.float32),
                            w1b.astype(jnp.bfloat16).astype(jnp.float32), b1b,
                            w2b.astype(jnp.bfloat16).astype(jnp.float32), b2b)
    assert out4.dtype == jnp.bfloat16
    assert jnp.allclose(out4.astype(jnp.float32), ref4,
                        atol=5e-2, rtol=5e-2), "test 4 mismatch"

    print("KERNEL_OK")
</pallas_src>

<mosaic_0001>
module attributes {stable_mosaic.version = 11 : i64} {
  func.func @_ffn_fused_kernel(%arg0: i32, %arg1: memref<16x32xf32, #tpu.memory_space<vmem>>, %arg2: memref<32x64xf32, #tpu.memory_space<vmem>>, %arg3: memref<1x64xf32, #tpu.memory_space<vmem>>, %arg4: memref<64x32xf32, #tpu.memory_space<vmem>>, %arg5: memref<1x32xf32, #tpu.memory_space<vmem>>, %arg6: memref<16x32xf32, #tpu.memory_space<vmem>>) attributes {dimension_semantics = [#tpu.dimension_semantics<parallel>], iteration_bounds = array<i64: 1>, scalar_prefetch = 0 : i64, scratch_operands = 0 : i64, tpu.core_type = #tpu.core_type<tc>, window_params = [{transform_indices = @transform_0, window_bounds = array<i64: 16, 32>}, {pipeline_mode = #tpu.pipeline_mode<synchronous>, transform_indices = @transform_1, window_bounds = array<i64: 32, 64>}, {pipeline_mode = #tpu.pipeline_mode<synchronous>, transform_indices = @transform_2, window_bounds = array<i64: 1, 64>}, {pipeline_mode = #tpu.pipeline_mode<synchronous>, transform_indices = @transform_3, window_bounds = array<i64: 64, 32>}, {pipeline_mode = #tpu.pipeline_mode<synchronous>, transform_indices = @transform_4, window_bounds = array<i64: 1, 32>}, {transform_indices = @transform_5, window_bounds = array<i64: 16, 32>}]} {
    %c0 = arith.constant 0 : index
    %c0_0 = arith.constant 0 : index
    %0 = vector.load %arg1[%c0, %c0_0] : memref<16x32xf32, #tpu.memory_space<vmem>>, vector<16x32xf32>
    %c0_1 = arith.constant 0 : index
    %c0_2 = arith.constant 0 : index
    %1 = vector.load %arg2[%c0_1, %c0_2] : memref<32x64xf32, #tpu.memory_space<vmem>>, vector<32x64xf32>
    %cst = arith.constant dense<0.000000e+00> : vector<16x64xf32>
    %2 = tpu.matmul %0, %1, %cst {dimension_numbers = #tpu.dot_dimension_numbers<[1], [0], [0], [1], [0, 0, 1, 1], [], []>} : vector<16x32xf32>, vector<32x64xf32>, vector<16x64xf32> -> vector<16x64xf32>
    %c0_3 = arith.constant 0 : index
    %c0_4 = arith.constant 0 : index
    %3 = vector.load %arg3[%c0_3, %c0_4] : memref<1x64xf32, #tpu.memory_space<vmem>>, vector<1x64xf32>
    %4 = vector.broadcast %3 : vector<1x64xf32> to vector<16x64xf32>
    %5 = arith.addf %2, %4 : vector<16x64xf32>
    %cst_5 = arith.constant 0.000000e+00 : f32
    %6 = vector.broadcast %cst_5 : f32 to vector<16x64xf32>
    %7 = arith.maximumf %5, %6 : vector<16x64xf32>
    %c0_6 = arith.constant 0 : index
    %c0_7 = arith.constant 0 : index
    %8 = vector.load %arg4[%c0_6, %c0_7] : memref<64x32xf32, #tpu.memory_space<vmem>>, vector<64x32xf32>
    %cst_8 = arith.constant dense<0.000000e+00> : vector<16x32xf32>
    %9 = tpu.matmul %7, %8, %cst_8 {dimension_numbers = #tpu.dot_dimension_numbers<[1], [0], [0], [1], [0, 0, 1, 1], [], []>} : vector<16x64xf32>, vector<64x32xf32>, vector<16x32xf32> -> vector<16x32xf32>
    %c0_9 = arith.constant 0 : index
    %c0_10 = arith.constant 0 : index
    %10 = vector.load %arg5[%c0_9, %c0_10] : memref<1x32xf32, #tpu.memory_space<vmem>>, vector<1x32xf32>
    %11 = vector.broadcast %10 : vector<1x32xf32> to vector<16x32xf32>
    %12 = arith.addf %9, %11 : vector<16x32xf32>
    %c0_11 = arith.constant 0 : index
    %c0_12 = arith.constant 0 : index
    %13 = vector.load %arg6[%c0_11, %c0_12] : memref<16x32xf32, #tpu.memory_space<vmem>>, vector<16x32xf32>
    tpu.vector_store %arg6[%c0_11, %c0_12], %12 {strides = array<i32>} : memref<16x32xf32, #tpu.memory_space<vmem>>, vector<16x32xf32>,
    return
  }
  func.func @transform_0(%arg0: i32) -> (i32, i32) {
    %c0_i32 = arith.constant 0 : i32
    %c0_i32_0 = arith.constant 0 : i32
    return %arg0, %c0_i32 : i32, i32
  }
  func.func @transform_1(%arg0: i32) -> (i32, i32) {
    %c0_i32 = arith.constant 0 : i32
    %c0_i32_0 = arith.constant 0 : i32
    %c0_i32_1 = arith.constant 0 : i32
    return %c0_i32, %c0_i32_0 : i32, i32
  }
  func.func @transform_2(%arg0: i32) -> (i32, i32) {
    %c0_i32 = arith.constant 0 : i32
    %c0_i32_0 = arith.constant 0 : i32
    %c0_i32_1 = arith.constant 0 : i32
    return %c0_i32, %c0_i32_0 : i32, i32
  }
  func.func @transform_3(%arg0: i32) -> (i32, i32) {
    %c0_i32 = arith.constant 0 : i32
    %c0_i32_0 = arith.constant 0 : i32
    %c0_i32_1 = arith.constant 0 : i32
    return %c0_i32, %c0_i32_0 : i32, i32
  }
  func.func @transform_4(%arg0: i32) -> (i32, i32) {
    %c0_i32 = arith.constant 0 : i32
    %c0_i32_0 = arith.constant 0 : i32
    %c0_i32_1 = arith.constant 0 : i32
    return %c0_i32, %c0_i32_0 : i32, i32
  }
  func.func @transform_5(%arg0: i32) -> (i32, i32) {
    %c0_i32 = arith.constant 0 : i32
    %c0_i32_0 = arith.constant 0 : i32
    return %arg0, %c0_i32 : i32, i32
  }
}

</mosaic_0001>

<bundles_post_ra>
// kernel: tpu_custom_call.1
= control target key start
LH: loop header
LB: loop body
LE: loop exit
PB: predicated region body
PF: predicated region fallthrough
CT: control target
= control target key end

     0   :  { %vm34_vm0 = vcmask 261120   ;;  %s433_s0 = inlined_call_operand.vmem [shape: f32[16,32], index: 0, kind: input, shape index: {}]   ;;  %s434_s1 = inlined_call_operand.vmem [shape: f32[32,64], index: 1, kind: input, shape index: {}]   ;;  %s435_s2 = inlined_call_operand.vmem [shape: f32[1,64], index: 2, kind: input, shape index: {}]   ;;  %s436_s3 = inlined_call_operand.vmem [shape: f32[64,32], index: 3, kind: input, shape index: {}]   ;;  %s437_s4 = inlined_call_operand.vmem [shape: f32[1,32], index: 4, kind: input, shape index: {}]   ;;  %s438_s5 = inlined_call_operand.hbm [shape: f32[16,32], index: 5, kind: output, shape index: {}]  }
   0x1   :  { %v23_v0 = vld [vmem:[%s434_s1] sm:$0xff]  ;;  %v24_v1 = vld [vmem:[%s434_s1 + $0x8] sm:$0xff]  ;;  %v25_v2 = vld [vmem:[%s434_s1 + $0x10] sm:$0xff] }
   0x2   :  { %v285_v3 = vpack.c.bf16 %v24_v1, %v23_v0  ;;  %v26_v4 = vld [vmem:[%s434_s1 + $0x18] sm:$0xff]  ;;  %v21_v5 = vld [vmem:[%s433_s0] sm:$0xff]  ;;  %v119_v8 = vld [vmem:[%s436_s3 + $0x8] sm:$0xff] }
   0x3   :  { %v289_v6 = vpack.c.bf16 %v26_v4, %v25_v2  ;;  %263 = vmatprep.mubr.msk.f32.mxu0 %vm34_vm0, %v21_v5  ;;  %v118_v7 = vld [vmem:[%s436_s3] sm:$0xff]  ;;  %v120_v9 = vld [vmem:[%s436_s3 + $0x10] sm:$0xff]  ;;  %v121_v11 = vld [vmem:[%s436_s3 + $0x18] sm:$0xff] }
   0x4   :  { %286 = vmatprep.subr.bf16.mxu0 %v285_v3  ;;  %v293_v10 = vpack.c.bf16 %v119_v8, %v118_v7  ;;  %v297_v12 = vpack.c.bf16 %v121_v11, %v120_v9  ;;  %v122_v13 = vld [vmem:[%s436_s3 + $0x20] sm:$0xff]  ;;  %v123_v14 = vld [vmem:[%s436_s3 + $0x28] sm:$0xff] }
   0x5   :  { %288 = vmatpush3.bf16.msra.mxu0 %v285_v3 }
   0x6   :  { %10 = vsyncpa [#allocation3], 0  ;;  %290 = vmatprep.subr.bf16.mxu0 %v289_v6  ;;  %294 = vmatprep.subr.bf16.mxu1 %v293_v10  ;;  %v301_v15 = vpack.c.bf16 %v123_v14, %v122_v13  ;;  %v22_v16 = vld [vmem:[%s433_s0 + $0x8] sm:$0xff]  ;;  %v124_v17 = vld [vmem:[%s436_s3 + $0x30] sm:$0xff]  ;;  %vm133_vm1 = vcmask 523264  }
   0x7   :  { %296 = vmatpush3.bf16.msra.mxu1 %v293_v10  ;;  %v125_v18 = vld [vmem:[%s436_s3 + $0x38] sm:$0xff]  ;;  %v233_v20 = vld [vmem:[%s435_s2] ss:$0 sm:$0xff]  ;;  %s336_s3 = smov [#allocation2]  }
   0x8   :  { %298 = vmatprep.subr.bf16.mxu1 %v297_v12  ;;  %v305_v19 = vpack.c.bf16 %v125_v18, %v124_v17  ;;  %v236_v27 = vld [vmem:[%s437_s4] ss:$0 sm:$0xff]  ;;  %s222_s23 = sshll.u32 %s336_s3, 4  ;;  %s223_s23 = int_to_ptr.vmem [resolvable:$true] %s222_s23 }
   0x9   :  { %292 = vmatpush3.bf16.msra.mxu0 %v289_v6  ;;  %s312_s2 = scalar_lea.vmem %s223_s23, 256  ;;  %p317_p1 = scmp.lt.s32.totalorder %s223_s23, %s223_s23 }
   0xa   :  { %p313_p0 = scmp.ne.s32.totalorder %s223_s23, %s312_s2  ;;  %p318_p2 = scmp.lt.s32.totalorder %s312_s2, %s312_s2 }
   0xb   :  { %300 = vmatpush3.bf16.msra.mxu1 %v297_v12 }
   0xc   :  { %264 = vmatmul.mubr.msk.f32.vlgmr.msra.gmra.mrb[0].mxu0 %vm34_vm0, %v22_v16  ;;  %302 = vmatprep.subr.bf16.mxu1 %v301_v15  ;;  %p319_p3 = por %p318_p2, %p317_p1 }
   0xe   :  { %p320_p4 = pnand %p319_p3, %p313_p0 }
   0xf   :  { %304 = vmatpush3.bf16.msra.mxu1 %v301_v15 }
  0x10   :  { %306 = vmatprep.subr.bf16.mxu1 %v305_v19 }
  0x13   :  { %308 = vmatpush3.bf16.msra.mxu1 %v305_v19 }
  0xdf   :  { %v265_v21 = vpop.f32.mrb[0].mxu0 }
  0xe0   :  { %v113_v22 = vadd.f32 %v265_v21, %v233_v20  ;;  %v107_v23 = vpop.f32.mrb[1].mxu0 }
  0xe1   :  { %v108_v24 = vadd.f32 %v233_v20, %v107_v23 }
  0xe2   :  { %v117_v26 = vmax.f32 %v113_v22, 0.0 }
  0xe3   :  { %v116_v25 = vmax.f32 %v108_v24, 0.0 }
  0xe5   :  { %282 = vmatprep.mubr.msk.f32.mxu1 %vm133_vm1, %v116_v25 }
  0xe6   :  { %283 = vmatmul.mubr.msk.f32.vlgmr.msra.gmra.mrb[0].mxu1 %vm133_vm1, %v117_v26 }
 0x1b9   :  { %v284_v28 = vpop.f32.mrb[0].mxu1 }
 0x1ba   :  { %v212_v29 = vadd.f32 %v284_v28, %v236_v27  ;;  %v206_v30 = vpop.f32.mrb[1].mxu1 }
 0x1bb   :  { %v207_v31 = vadd.f32 %v236_v27, %v206_v30 }
 0x1bc   :  { %216 = vst.msk [vmem:[#allocation2 + $0x8] sm:$0xff] %vm34_vm0, %v212_v29 }
 0x1bd   :  { %215 = vst.msk [vmem:[#allocation2] sm:$0xff] %vm34_vm0, %v207_v31 }
 0x1be   :  { %323 = shalt.err (!%p320_p4)
}
 0x1bf   :  { %s324_s25 = scalar_lea.hbm %s438_s5, 256 }
 0x1c0   :  { %p325_p5 = scmp.ne.s32.totalorder %s438_s5, %s324_s25  ;;  %p328_p6 = scmp.lt.u32.totalorder %s324_s25, %s438_s5 }
 0x1c2   :  { %p330_p7 = pnand %p328_p6, %p325_p5 }
 0x1c4   :  { %333 = shalt.err (!%p330_p7)
}
 0x1c5   :  { %s337_s30 = smov 128   ;;  %s338_s6 = smov 8  }
 0x1c6   :  { %228 = dma.vmem_to_hbm [thread:$0]  %s223_s23, 256, %s438_s5, [#allocation3], %s337_s30, %s337_s30, %s338_s6  }
 0x1c7   :  { %334 = dma.done.wait [#allocation3], 256  }
 0x1c8   :  { %335 = vsyncadd [#allocation3], 4294967040 }
 0x1c9   :  { %232 = vsyncpa [#allocation3], 1 }

</bundles_post_ra>
